<compile_context>
chip_gen: v7x
topology: tpu7x:2x2x1
jax: 0.10.0
libtpu: 0.0.40
codegen_flags: <defaults>
</compile_context>

<pallas_src>
import functools

import jax
import jax.numpy as jnp
from jax import lax
from jax.experimental import pallas as pl
from jax.experimental.pallas import tpu as pltpu


def _round_up(x, m):
    return ((x + m - 1) // m) * m


def _lora_linear_kernel(x_ref, w_ref, la_ref, lb_ref, b_ref, o_ref,
                        acc_ref, xa_ref, *, scale):
    j = pl.program_id(1)
    k = pl.program_id(2)

    @pl.when(k == 0)
    def _init_acc():
        acc_ref[...] = jnp.zeros_like(acc_ref)

    @pl.when(jnp.logical_and(j == 0, k == 0))
    def _init_xa():
        xa_ref[...] = jnp.zeros_like(xa_ref)

    # Base matmul: x (tm, tk) . W (tn, tk), contracting the shared "in" dim.
    # No transpose, native dtype in, f32 accumulation out.
    acc_ref[...] += lax.dot_general(
        x_ref[...], w_ref[...],
        dimension_numbers=(((1,), (1,)), ((), ())),
        preferred_element_type=jnp.float32)

    # LoRA down-projection xa = x @ A^T, accumulated over k.  The x block is
    # independent of j, so compute it only on the first j sweep and reuse it.
    @pl.when(j == 0)
    def _lora_down():
        xa_ref[...] += lax.dot_general(
            x_ref[...], la_ref[...],
            dimension_numbers=(((1,), (1,)), ((), ())),
            preferred_element_type=jnp.float32)

    # Epilogue on the last K step only: LoRA up-projection + bias + cast.
    @pl.when(k == pl.num_programs(2) - 1)
    def _epilogue():
        lora_up = lax.dot_general(
            xa_ref[...], lb_ref[...].astype(jnp.float32),
            dimension_numbers=(((1,), (1,)), ((), ())),
            preferred_element_type=jnp.float32)
        y = acc_ref[...] + scale * lora_up + b_ref[...].astype(jnp.float32)
        o_ref[...] = y.astype(o_ref.dtype)


def lora_linear(x, base_weight, base_bias, lora_A, lora_B, scale,
                *, tm=256, tn=256, tk=512):
    """x: (M, in), base_weight: (out, in), base_bias: (out,),
    lora_A: (rank, in), lora_B: (out, rank).  Returns (M, out).

    NOTE: `scale` is treated as a static hyperparameter (baked into the
    kernel); a traced scale would force recompilation.
    """
    M, in_f = x.shape
    out_f, in_f2 = base_weight.shape
    assert in_f2 == in_f
    rank = lora_A.shape[0]
    assert lora_B.shape == (out_f, rank)

    # Clamp tile sizes to the (tile-aligned) problem dims.
    tm = min(tm, _round_up(M, 8))
    tn = min(tn, _round_up(out_f, 128))
    tk = min(tk, _round_up(in_f, 128))

    Mp = _round_up(M, tm)
    Np = _round_up(out_f, tn)
    Kp = _round_up(in_f, tk)
    Rp = _round_up(rank, 8)

    # Zero padding keeps the math exact (padded rows/cols contribute 0) and
    # makes the output lane-dense (last dim a multiple of 128).
    x_p = jnp.pad(x, ((0, Mp - M), (0, Kp - in_f)))
    w_p = jnp.pad(base_weight, ((0, Np - out_f), (0, Kp - in_f)))
    la_p = jnp.pad(lora_A, ((0, Rp - rank), (0, Kp - in_f)))
    lb_p = jnp.pad(lora_B, ((0, Np - out_f), (0, Rp - rank)))
    b_p = jnp.pad(base_bias, (0, Np - out_f)).reshape(1, Np)

    grid = (Mp // tm, Np // tn, Kp // tk)
    kernel = functools.partial(_lora_linear_kernel, scale=float(scale))

    out = pl.pallas_call(
        kernel,
        out_shape=jax.ShapeDtypeStruct((Mp, Np), x.dtype),
        grid_spec=pltpu.PrefetchScalarGridSpec(
            num_scalar_prefetch=0,
            grid=grid,
            in_specs=[
                pl.BlockSpec((tm, tk), lambda i, j, k: (i, k)),   # x
                pl.BlockSpec((tn, tk), lambda i, j, k: (j, k)),   # W (out, in)
                pl.BlockSpec((Rp, tk), lambda i, j, k: (0, k)),   # lora_A
                pl.BlockSpec((tn, Rp), lambda i, j, k: (j, 0)),   # lora_B
                pl.BlockSpec((1, tn), lambda i, j, k: (0, j)),    # bias
            ],
            out_specs=pl.BlockSpec((tm, tn), lambda i, j, k: (i, j)),
            scratch_shapes=[
                pltpu.VMEM((tm, tn), jnp.float32),   # base-matmul accumulator
                pltpu.VMEM((tm, Rp), jnp.float32),   # xa = x @ A^T accumulator
            ],
        ),
        compiler_params=pltpu.CompilerParams(
            # i (M blocks) shards across TensorCores; j must stay sequential
            # because the xa scratch computed at j==0 is reused for j>0;
            # k is the reduction axis.
            dimension_semantics=("parallel", "arbitrary", "arbitrary")),
    )(x_p, w_p, la_p, lb_p, b_p)

    return out[:M, :out_f]


if __name__ == "__main__":
    # Small shapes consistent with the module: Linear(in=32 -> out=32), rank=4.
    M, in_features, out_features, rank = 8, 32, 32, 4
    scale = 0.5

    key = jax.random.PRNGKey(0)
    k_x, k_w, k_b, k_a, k_bb = jax.random.split(key, 5)

    x = jax.random.normal(k_x, (M, in_features), dtype=jnp.float32)

    # Deterministic "base_module" (nn.Linear) parameters.
    base_weight = jax.random.normal(
        k_w, (out_features, in_features), dtype=jnp.float32) * 0.1
    base_bias = jax.random.normal(k_b, (out_features,), dtype=jnp.float32) * 0.1

    # LoRA params.  The module's _reset_parameters() uses
    # kaiming_uniform_(a=sqrt(rank)) for lora_A and zeros for lora_B; here we
    # use a random lora_B so the LoRA path is actually exercised numerically.
    a_slope = jnp.sqrt(float(rank))
    bound = jnp.sqrt(6.0 / ((1.0 + a_slope ** 2) * in_features))
    lora_A = jax.random.uniform(k_a, (rank, in_features), dtype=jnp.float32,
                                minval=-bound, maxval=bound)
    lora_B = jax.random.normal(k_bb, (out_features, rank),
                               dtype=jnp.float32) * 0.1

    y = lora_linear(x, base_weight, base_bias, lora_A, lora_B, scale)
    y = jax.block_until_ready(y)

    # Pure-JAX reference (mirrors the PyTorch forward exactly).
    w_eff = base_weight + scale * (lora_B @ lora_A)
    y_ref = x @ w_eff.T + base_bias
    assert y.shape == y_ref.shape, (y.shape, y_ref.shape)
    assert jnp.allclose(y, y_ref, atol=1e-4, rtol=1e-4), "mismatch vs reference"

    print("KERNEL_OK")
</pallas_src>

<mosaic_0001>
module attributes {stable_mosaic.version = 11 : i64} {
  func.func @_lora_linear_kernel(%arg0: i32, %arg1: i32, %arg2: i32, %arg3: memref<8x128xf32, #tpu.memory_space<vmem>>, %arg4: memref<128x128xf32, #tpu.memory_space<vmem>>, %arg5: memref<8x128xf32, #tpu.memory_space<vmem>>, %arg6: memref<128x8xf32, #tpu.memory_space<vmem>>, %arg7: memref<1x128xf32, #tpu.memory_space<vmem>>, %arg8: memref<8x128xf32, #tpu.memory_space<vmem>>, %arg9: memref<8x128xf32, #tpu.memory_space<vmem>>, %arg10: memref<8x8xf32, #tpu.memory_space<vmem>>) attributes {dimension_semantics = [#tpu.dimension_semantics<parallel>, #tpu.dimension_semantics<arbitrary>, #tpu.dimension_semantics<arbitrary>], iteration_bounds = array<i64: 1, 1, 1>, scalar_prefetch = 0 : i64, scratch_operands = 2 : i64, tpu.core_type = #tpu.core_type<tc>, window_params = [{transform_indices = @transform_0, window_bounds = array<i64: 8, 128>}, {transform_indices = @transform_1, window_bounds = array<i64: 128, 128>}, {transform_indices = @transform_2, window_bounds = array<i64: 8, 128>}, {transform_indices = @transform_3, window_bounds = array<i64: 128, 8>}, {transform_indices = @transform_4, window_bounds = array<i64: 1, 128>}, {transform_indices = @transform_5, window_bounds = array<i64: 8, 128>}]} {
    %c0_i32 = arith.constant 0 : i32
    %0 = arith.cmpi eq, %arg2, %c0_i32 : i32
    %1 = arith.extui %0 : i1 to i32
    %c0_i32_0 = arith.constant 0 : i32
    %2 = arith.cmpi ne, %1, %c0_i32_0 : i32
    scf.if %2 {
      %cst_15 = arith.constant 0.000000e+00 : f32
      %20 = vector.broadcast %cst_15 : f32 to vector<8x128xf32>
      %c0_16 = arith.constant 0 : index
      %c0_17 = arith.constant 0 : index
      %21 = vector.load %arg9[%c0_16, %c0_17] : memref<8x128xf32, #tpu.memory_space<vmem>>, vector<8x128xf32>
      tpu.vector_store %arg9[%c0_16, %c0_17], %20 {strides = array<i32>} : memref<8x128xf32, #tpu.memory_space<vmem>>, vector<8x128xf32>,
    } else {
    }
    %c0_i32_1 = arith.constant 0 : i32
    %3 = arith.cmpi eq, %arg1, %c0_i32_1 : i32
    %c0_i32_2 = arith.constant 0 : i32
    %4 = arith.cmpi eq, %arg2, %c0_i32_2 : i32
    %5 = arith.andi %3, %4 : i1
    %6 = arith.extui %5 : i1 to i32
    %c0_i32_3 = arith.constant 0 : i32
    %7 = arith.cmpi ne, %6, %c0_i32_3 : i32
    scf.if %7 {
      %cst_15 = arith.constant 0.000000e+00 : f32
      %20 = vector.broadcast %cst_15 : f32 to vector<8x8xf32>
      %c0_16 = arith.constant 0 : index
      %c0_17 = arith.constant 0 : index
      %21 = vector.load %arg10[%c0_16, %c0_17] : memref<8x8xf32, #tpu.memory_space<vmem>>, vector<8x8xf32>
      tpu.vector_store %arg10[%c0_16, %c0_17], %20 {strides = array<i32>} : memref<8x8xf32, #tpu.memory_space<vmem>>, vector<8x8xf32>,
    } else {
    }
    %c0 = arith.constant 0 : index
    %c0_4 = arith.constant 0 : index
    %8 = vector.load %arg9[%c0, %c0_4] : memref<8x128xf32, #tpu.memory_space<vmem>>, vector<8x128xf32>
    %c0_5 = arith.constant 0 : index
    %c0_6 = arith.constant 0 : index
    %9 = vector.load %arg3[%c0_5, %c0_6] : memref<8x128xf32, #tpu.memory_space<vmem>>, vector<8x128xf32>
    %c0_7 = arith.constant 0 : index
    %c0_8 = arith.constant 0 : index
    %10 = vector.load %arg4[%c0_7, %c0_8] : memref<128x128xf32, #tpu.memory_space<vmem>>, vector<128x128xf32>
    %cst = arith.constant dense<0.000000e+00> : vector<8x128xf32>
    %11 = tpu.matmul %9, %10, %cst {dimension_numbers = #tpu.dot_dimension_numbers<[1], [1], [0], [0], [0, 0, 1, 0], [], []>} : vector<8x128xf32>, vector<128x128xf32>, vector<8x128xf32> -> vector<8x128xf32>
    %12 = arith.addf %8, %11 : vector<8x128xf32>
    %c0_9 = arith.constant 0 : index
    %c0_10 = arith.constant 0 : index
    %13 = vector.load %arg9[%c0_9, %c0_10] : memref<8x128xf32, #tpu.memory_space<vmem>>, vector<8x128xf32>
    tpu.vector_store %arg9[%c0_9, %c0_10], %12 {strides = array<i32>} : memref<8x128xf32, #tpu.memory_space<vmem>>, vector<8x128xf32>,
    %c0_i32_11 = arith.constant 0 : i32
    %14 = arith.cmpi eq, %arg1, %c0_i32_11 : i32
    %15 = arith.extui %14 : i1 to i32
    %c0_i32_12 = arith.constant 0 : i32
    %16 = arith.cmpi ne, %15, %c0_i32_12 : i32
    scf.if %16 {
      %c0_15 = arith.constant 0 : index
      %c0_16 = arith.constant 0 : index
      %20 = vector.load %arg10[%c0_15, %c0_16] : memref<8x8xf32, #tpu.memory_space<vmem>>, vector<8x8xf32>
      %c0_17 = arith.constant 0 : index
      %c0_18 = arith.constant 0 : index
      %21 = vector.load %arg3[%c0_17, %c0_18] : memref<8x128xf32, #tpu.memory_space<vmem>>, vector<8x128xf32>
      %c0_19 = arith.constant 0 : index
      %c0_20 = arith.constant 0 : index
      %22 = vector.load %arg5[%c0_19, %c0_20] : memref<8x128xf32, #tpu.memory_space<vmem>>, vector<8x128xf32>
      %cst_21 = arith.constant dense<0.000000e+00> : vector<8x8xf32>
      %23 = tpu.matmul %21, %22, %cst_21 {dimension_numbers = #tpu.dot_dimension_numbers<[1], [1], [0], [0], [0, 0, 1, 0], [], []>} : vector<8x128xf32>, vector<8x128xf32>, vector<8x8xf32> -> vector<8x8xf32>
      %24 = arith.addf %20, %23 : vector<8x8xf32>
      %c0_22 = arith.constant 0 : index
      %c0_23 = arith.constant 0 : index
      %25 = vector.load %arg10[%c0_22, %c0_23] : memref<8x8xf32, #tpu.memory_space<vmem>>, vector<8x8xf32>
      tpu.vector_store %arg10[%c0_22, %c0_23], %24 {strides = array<i32>} : memref<8x8xf32, #tpu.memory_space<vmem>>, vector<8x8xf32>,
    } else {
    }
    %c0_i32_13 = arith.constant 0 : i32
    %17 = arith.cmpi eq, %arg2, %c0_i32_13 : i32
    %18 = arith.extui %17 : i1 to i32
    %c0_i32_14 = arith.constant 0 : i32
    %19 = arith.cmpi ne, %18, %c0_i32_14 : i32
    scf.if %19 {
      %c0_15 = arith.constant 0 : index
      %c0_16 = arith.constant 0 : index
      %20 = vector.load %arg10[%c0_15, %c0_16] : memref<8x8xf32, #tpu.memory_space<vmem>>, vector<8x8xf32>
      %c0_17 = arith.constant 0 : index
      %c0_18 = arith.constant 0 : index
      %21 = vector.load %arg6[%c0_17, %c0_18] : memref<128x8xf32, #tpu.memory_space<vmem>>, vector<128x8xf32>
      %cst_19 = arith.constant dense<0.000000e+00> : vector<8x128xf32>
      %22 = tpu.matmul %20, %21, %cst_19 {dimension_numbers = #tpu.dot_dimension_numbers<[1], [1], [0], [0], [0, 0, 1, 0], [], []>} : vector<8x8xf32>, vector<128x8xf32>, vector<8x128xf32> -> vector<8x128xf32>
      %c0_20 = arith.constant 0 : index
      %c0_21 = arith.constant 0 : index
      %23 = vector.load %arg9[%c0_20, %c0_21] : memref<8x128xf32, #tpu.memory_space<vmem>>, vector<8x128xf32>
      %cst_22 = arith.constant 5.000000e-01 : f32
      %24 = vector.broadcast %cst_22 : f32 to vector<8x128xf32>
      %25 = arith.mulf %24, %22 : vector<8x128xf32>
      %26 = arith.addf %23, %25 : vector<8x128xf32>
      %c0_23 = arith.constant 0 : index
      %c0_24 = arith.constant 0 : index
      %27 = vector.load %arg7[%c0_23, %c0_24] : memref<1x128xf32, #tpu.memory_space<vmem>>, vector<1x128xf32>
      %28 = vector.broadcast %27 : vector<1x128xf32> to vector<8x128xf32>
      %29 = arith.addf %26, %28 : vector<8x128xf32>
      %c0_25 = arith.constant 0 : index
      %c0_26 = arith.constant 0 : index
      %30 = vector.load %arg8[%c0_25, %c0_26] : memref<8x128xf32, #tpu.memory_space<vmem>>, vector<8x128xf32>
      tpu.vector_store %arg8[%c0_25, %c0_26], %29 {strides = array<i32>} : memref<8x128xf32, #tpu.memory_space<vmem>>, vector<8x128xf32>,
    } else {
    }
    return
  }
  func.func @transform_0(%arg0: i32, %arg1: i32, %arg2: i32) -> (i32, i32) {
    %c0_i32 = arith.constant 0 : i32
    return %arg0, %arg2 : i32, i32
  }
  func.func @transform_1(%arg0: i32, %arg1: i32, %arg2: i32) -> (i32, i32) {
    %c0_i32 = arith.constant 0 : i32
    return %arg1, %arg2 : i32, i32
  }
  func.func @transform_2(%arg0: i32, %arg1: i32, %arg2: i32) -> (i32, i32) {
    %c0_i32 = arith.constant 0 : i32
    %c0_i32_0 = arith.constant 0 : i32
    return %c0_i32, %arg2 : i32, i32
  }
  func.func @transform_3(%arg0: i32, %arg1: i32, %arg2: i32) -> (i32, i32) {
    %c0_i32 = arith.constant 0 : i32
    %c0_i32_0 = arith.constant 0 : i32
    return %arg1, %c0_i32 : i32, i32
  }
  func.func @transform_4(%arg0: i32, %arg1: i32, %arg2: i32) -> (i32, i32) {
    %c0_i32 = arith.constant 0 : i32
    %c0_i32_0 = arith.constant 0 : i32
    return %c0_i32, %arg1 : i32, i32
  }
  func.func @transform_5(%arg0: i32, %arg1: i32, %arg2: i32) -> (i32, i32) {
    %c0_i32 = arith.constant 0 : i32
    return %arg0, %arg1 : i32, i32
  }
}

</mosaic_0001>

<bundles_post_ra>
// kernel: tpu_custom_call.1
= control target key start
LH: loop header
LB: loop body
LE: loop exit
PB: predicated region body
PF: predicated region fallthrough
CT: control target
= control target key end

     0   :  { %10 = vsyncpa [#allocation5], 0  ;;  %s830_s0 = inlined_call_operand.vmem [shape: f32[8,128], index: 0, kind: input, shape index: {}]   ;;  %s831_s1 = inlined_call_operand.vmem [shape: f32[128,128], index: 1, kind: input, shape index: {}]   ;;  %s832_s2 = inlined_call_operand.hbm [shape: f32[8,128], index: 2, kind: input, shape index: {}]   ;;  %s833_s3 = inlined_call_operand.vmem [shape: f32[128,8], index: 3, kind: input, shape index: {}]   ;;  %s834_s4 = inlined_call_operand.vmem [shape: f32[1,128], index: 4, kind: input, shape index: {}]   ;;  %s835_s5 = inlined_call_operand.hbm [shape: f32[8,128], index: 5, kind: output, shape index: {}]  }
   0x1   :  { %11 = vsyncpa [#allocation6], 0  ;;  %s621_s18 = smov [#allocation4]   ;;  %s573_s22 = scalar_lea.hbm %s832_s2, 128 }
   0x2   :  { %s22_s19 = sshll.u32 %s621_s18, 4  ;;  %p574_p0 = scmp.ne.s32.totalorder %s832_s2, %s573_s22  ;;  %s23_s19 = int_to_ptr.vmem [resolvable:$true] %s22_s19 }
   0x3   :  { %p577_p1 = scmp.lt.u32.totalorder %s573_s22, %s832_s2 }
   0x5   :  { %p579_p2 = pnand %p577_p1, %p574_p0 }
   0x7   :  { %582 = shalt.err (!%p579_p2)
}
   0x8   :  { %s583_s27 = scalar_lea.vmem %s23_s19, 128  ;;  %p588_p4 = scmp.lt.s32.totalorder %s23_s19, %s23_s19 }
   0x9   :  { %p584_p3 = scmp.ne.s32.totalorder %s23_s19, %s583_s27  ;;  %p589_p5 = scmp.lt.s32.totalorder %s583_s27, %s583_s27 }
   0xb   :  { %p590_p6 = por %p589_p5, %p588_p4 }
   0xd   :  { %p591_p7 = pnand %p590_p6, %p584_p3 }
   0xf   :  { %594 = shalt.err (!%p591_p7)
}
  0x10   :  { %25 = dma.hbm_to_vmem [thread:$0]  %s832_s2, 128, %s23_s19, [#allocation5]  }
  0x11   :  { %617 = dma.done.wait [#allocation5], 128  }
  0x12   :  { %618 = vsyncadd [#allocation5], 4294967168  ;;  %vm43_vm0 = vcmask 64512   ;;  %v622_v0 = vmov 0.0   ;;  %vm623_vm1 = vmmov 0   ;;  %v624_v1 = vmov 0.0|0.0  }
  0x13   :  { %44 = vst.msk [vmem:[#allocation3] sm:$0xff] %vm43_vm0, %v622_v0  ;;  %472 = vmatprep.subr.mxu1 %v622_v0  ;;  %474 = vmatprep.mubr.msk.f32.mxu1 %vm623_vm1, %v622_v0  ;;  %v140_v2 = vld [vmem:[#allocation4] sm:$0xff]  ;;  %v675_v3 = vld [vmem:[%s830_s0] sm:$0xff]  ;;  %vm692_vm2 = vmpackc.low %vm43_vm0, %vm43_vm0  ;;  %s625_s15 = smov [#allocation7]  }
  0x14   :  { %512 = vmatprep.subr.bf16.mxu0 %v624_v1  ;;  %469 = vmatprep.mubr.msk.f32.mxu0 %vm623_vm1, %v622_v0  ;;  %v218_v4 = vld [vmem:[%s833_s3] sm:$0xff]  ;;  %v219_v5 = vld [vmem:[%s833_s3 + $0x8] sm:$0xff]  ;;  %v49_v11 = vld [vmem:[%s831_s1 + $0x10] sm:$0xff]  ;;  %s374_s16 = sshll.u32 %s625_s15, 4  ;;  %s375_s16 = int_to_ptr.vmem [resolvable:$true] %s374_s16 }
  0x15   :  { %473 = vmatpush3.xpose.msra.mxu1 %v140_v2  ;;  %v47_v6 = vld [vmem:[%s831_s1] sm:$0xff]  ;;  %v48_v7 = vld [vmem:[%s831_s1 + $0x8] sm:$0xff]  ;;  %v537_v8 = vpack.c.bf16 %v219_v5, %v218_v4  ;;  %v50_v12 = vld [vmem:[%s831_s1 + $0x18] sm:$0xff]  ;;  %s595_s17 = scalar_lea.vmem %s375_s16, 128  ;;  %p600_p9 = scmp.lt.s32.totalorder %s375_s16, %s375_s16 }
  0x16   :  { %536 = vmatprep.subr.bf16.mxu1 %v624_v1  ;;  %v513_v10 = vpack.c.bf16 %v48_v7, %v47_v6  ;;  %v220_v13 = vld [vmem:[%s833_s3 + $0x10] sm:$0xff]  ;;  %v221_v14 = vld [vmem:[%s833_s3 + $0x18] sm:$0xff]  ;;  %v516_v15 = vpack.c.bf16 %v50_v12, %v49_v11  ;;  %v51_v17 = vld [vmem:[%s831_s1 + $0x20] sm:$0xff]  ;;  %p596_p8 = scmp.ne.s32.totalorder %s375_s16, %s595_s17  ;;  %p601_p10 = scmp.lt.s32.totalorder %s595_s17, %s595_s17 }
  0x17   :  { %v541_v16 = vpack.c.bf16 %v221_v14, %v220_v13  ;;  %v52_v18 = vld [vmem:[%s831_s1 + $0x28] sm:$0xff]  ;;  %v222_v19 = vld [vmem:[%s833_s3 + $0x20] sm:$0xff]  ;;  %v53_v23 = vld [vmem:[%s831_s1 + $0x30] sm:$0xff] }
  0x18   :  { %475 = vmatmul.mubr.f32.vlgmr.msra.gmra.mrb[0].mxu1 %v675_v3  ;;  %514 = vmatpush3.bf16.xpose.msra.mxu0 %v513_v10  ;;  %v223_v20 = vld [vmem:[%s833_s3 + $0x28] sm:$0xff]  ;;  %v519_v21 = vpack.c.bf16 %v52_v18, %v51_v17  ;;  %v54_v24 = vld [vmem:[%s831_s1 + $0x38] sm:$0xff]  ;;  %v224_v25 = vld [vmem:[%s833_s3 + $0x30] sm:$0xff]  ;;  %p602_p11 = por %p601_p10, %p600_p9 }
  0x19   :  { %539 = vmatpush3.bf16.xpose.msk.msra.mxu1 %vm692_vm2, %v537_v8  ;;  %515 = vmatprep.subr.bf16.mxu0 %v624_v1  ;;  %v545_v22 = vpack.c.bf16 %v223_v20, %v222_v19  ;;  %v225_v26 = vld [vmem:[%s833_s3 + $0x38] sm:$0xff]  ;;  %v522_v27 = vpack.c.bf16 %v54_v24, %v53_v23  ;;  %v55_v29 = vld [vmem:[%s831_s1 + $0x40] sm:$0xff]  ;;  %v56_v30 = vld [vmem:[%s831_s1 + $0x48] sm:$0xff] }
  0x1a   :  { %540 = vmatprep.subr.bf16.mxu1 %v624_v1  ;;  %509 = vmatprep.mubr.msk.f32.mxu1 %vm623_vm1, %v622_v0  ;;  %v549_v28 = vpack.c.bf16 %v225_v26, %v224_v25  ;;  %v226_v31 = vld [vmem:[%s833_s3 + $0x40] sm:$0xff]  ;;  %v227_v32 = vld [vmem:[%s833_s3 + $0x48] sm:$0xff]  ;;  %v525_v33 = vpack.c.bf16 %v56_v30, %v55_v29  ;;  %v57_v35 = vld [vmem:[%s831_s1 + $0x50] sm:$0xff]  ;;  %p603_p12 = pnand %p602_p11, %p596_p8 }
  0x1b   :  { %v553_v34 = vpack.c.bf16 %v227_v32, %v226_v31  ;;  %v58_v36 = vld [vmem:[%s831_s1 + $0x58] sm:$0xff]  ;;  %v228_v37 = vld [vmem:[%s833_s3 + $0x50] sm:$0xff]  ;;  %v59_v41 = vld [vmem:[%s831_s1 + $0x60] sm:$0xff] }
  0x1c   :  { %v229_v38 = vld [vmem:[%s833_s3 + $0x58] sm:$0xff]  ;;  %v528_v39 = vpack.c.bf16 %v58_v36, %v57_v35  ;;  %v60_v42 = vld [vmem:[%s831_s1 + $0x68] sm:$0xff]  ;;  %v230_v43 = vld [vmem:[%s833_s3 + $0x60] sm:$0xff] }
  0x1d   :  { %v557_v40 = vpack.c.bf16 %v229_v38, %v228_v37  ;;  %v231_v44 = vld [vmem:[%s833_s3 + $0x68] sm:$0xff]  ;;  %v531_v45 = vpack.c.bf16 %v60_v42, %v59_v41  ;;  %v232_v47 = vld [vmem:[%s833_s3 + $0x70] sm:$0xff]  ;;  %v233_v48 = vld [vmem:[%s833_s3 + $0x78] sm:$0xff] }
  0x1e   :  { %v561_v46 = vpack.c.bf16 %v231_v44, %v230_v43  ;;  %v565_v49 = vpack.c.bf16 %v233_v48, %v232_v47  ;;  %v61_v50 = vld [vmem:[%s831_s1 + $0x70] sm:$0xff]  ;;  %v62_v51 = vld [vmem:[%s831_s1 + $0x78] sm:$0xff]  ;;  %v138_v53 = vld [vmem:[#allocation3] sm:$0xff] }
  0x1f   :  { %v534_v52 = vpack.c.bf16 %v62_v51, %v61_v50  ;;  %v400_v63 = vld [vmem:[%s834_s4] ss:$0 sm:$0xff] }
  0x20   :  { %517 = vmatpush3.bf16.xpose.msra.mxu0 %v516_v15 }
  0x21   :  { %543 = vmatpush3.bf16.xpose.msk.msra.mxu1 %vm692_vm2, %v541_v16  ;;  %518 = vmatprep.subr.bf16.mxu0 %v624_v1 }
  0x22   :  { %544 = vmatprep.subr.bf16.mxu1 %v624_v1 }
  0x28   :  { %520 = vmatpush3.bf16.xpose.msra.mxu0 %v519_v21 }
  0x29   :  { %547 = vmatpush3.bf16.xpose.msk.msra.mxu1 %vm692_vm2, %v545_v22  ;;  %521 = vmatprep.subr.bf16.mxu0 %v624_v1 }
  0x2a   :  { %548 = vmatprep.subr.bf16.mxu1 %v624_v1 }
  0x30   :  { %523 = vmatpush3.bf16.xpose.msra.mxu0 %v522_v27 }
  0x31   :  { %551 = vmatpush3.bf16.xpose.msk.msra.mxu1 %vm692_vm2, %v549_v28  ;;  %524 = vmatprep.subr.bf16.mxu0 %v624_v1 }
  0x32   :  { %552 = vmatprep.subr.bf16.mxu1 %v624_v1 }
  0x38   :  { %526 = vmatpush3.bf16.xpose.msra.mxu0 %v525_v33 }
  0x39   :  { %555 = vmatpush3.bf16.xpose.msk.msra.mxu1 %vm692_vm2, %v553_v34  ;;  %527 = vmatprep.subr.bf16.mxu0 %v624_v1 }
  0x3a   :  { %556 = vmatprep.subr.bf16.mxu1 %v624_v1 }
  0x40   :  { %529 = vmatpush3.bf16.xpose.msra.mxu0 %v528_v39 }
  0x41   :  { %559 = vmatpush3.bf16.xpose.msk.msra.mxu1 %vm692_vm2, %v557_v40  ;;  %530 = vmatprep.subr.bf16.mxu0 %v624_v1 }
  0x42   :  { %560 = vmatprep.subr.bf16.mxu1 %v624_v1 }
  0x48   :  { %532 = vmatpush3.bf16.xpose.msra.mxu0 %v531_v45 }
  0x49   :  { %563 = vmatpush3.bf16.xpose.msk.msra.mxu1 %vm692_vm2, %v561_v46  ;;  %533 = vmatprep.subr.bf16.mxu0 %v624_v1 }
  0x4a   :  { %564 = vmatprep.subr.bf16.mxu1 %v624_v1 }
  0x50   :  { %535 = vmatpush3.bf16.xpose.msra.mxu0 %v534_v52 }
  0x51   :  { %567 = vmatpush3.bf16.xpose.msk.msra.mxu1 %vm692_vm2, %v565_v49 }
  0x57   :  { %470 = vmatmul.mubr.f32.vlgmr.msra.gmra.mrb[0].mxu0 %v675_v3 }
  0xeb   :  { %v207_v54 = vpop.f32.mrb[0].mxu1 }
  0xec   :  { %v211_v55 = vadd.f32 %v207_v54, %v138_v53  ;;  %v476_v56 = vpop.f32.mrb[1].mxu1 }
  0xee   :  { %213 = vst.msk [vmem:[#allocation3] sm:$0xff] %vm43_vm0, %v211_v55 }
  0xf5   :  { %v217_v57 = vld [vmem:[#allocation3] sm:$0xff] }
  0xf6   :  { %510 = vmatmul.mubr.msk.f32.vlgmr.msra.gmra.mrb[2].mxu1 %vm43_vm0, %v217_v57 }
 0x12a   :  { %v129_v58 = vpop.f32.mrb[0].mxu0 }
 0x12b   :  { %v471_v59 = vpop.f32.mrb[1].mxu0 }
 0x1c9   :  { %v352_v60 = vpop.f32.mrb[2].mxu1 }
 0x1ca   :  { %v357_v61 = vmul.f32 0.5, %v352_v60  ;;  %v511_v62 = vpop.f32.mrb[3].mxu1 }
 0x1cc   :  { %v358_v0 = vadd.f32 %v357_v61, %v129_v58 }
 0x1ce   :  { %v366_v1 = vadd.f32 %v400_v63, %v358_v0 }
 0x1d0   :  { %367 = vst [vmem:[#allocation7] sm:$0xff] %v366_v1 }
 0x1d1   :  { %606 = shalt.err (!%p603_p12)
}
 0x1d2   :  { %s607_s20 = scalar_lea.hbm %s835_s5, 128 }
 0x1d3   :  { %p608_p13 = scmp.ne.s32.totalorder %s835_s5, %s607_s20  ;;  %p611_p0 = scmp.lt.u32.totalorder %s607_s20, %s835_s5 }
 0x1d5   :  { %p613_p1 = pnand %p611_p0, %p608_p13 }
 0x1d7   :  { %616 = shalt.err (!%p613_p1)
}
 0x1d8   :  { %377 = dma.vmem_to_hbm [thread:$0]  %s375_s16, 128, %s835_s5, [#allocation6]  }
 0x1d9   :  { %619 = dma.done.wait [#allocation6], 128  }
 0x1da   :  { %620 = vsyncadd [#allocation6], 4294967168 }
 0x1db   :  { %381 = vsyncpa [#allocation5], 1 }
 0x1dc   :  { %382 = vsyncpa [#allocation6], 1 }

</bundles_post_ra>
